<compile_context>
chip_gen: v5e
topology: v5e:2x2
jax: 0.10.0
libtpu: 0.0.40
codegen_flags: <defaults>
</compile_context>

<pallas_src>
import functools

import jax
import jax.numpy as jnp
from jax import lax
from jax.experimental import pallas as pl
from jax.experimental.pallas import tpu as pltpu

_VMEM_LIMIT_BYTES = 32 * 1024 * 1024   # explicit scoped limit (safe on v5e/v6e/v7x)
_BLOCK_BUDGET_CAP = 16 * 1024 * 1024   # max bytes for double-buffered blocks + temps


def _layernorm_kernel(x_ref, g_ref, o_ref, *, eps):
    # x_ref: (1, C, t_l) in input dtype, g_ref: (C, 1) f32, o_ref: (1, C, t_l)
    x = x_ref[0].astype(jnp.float32)                       # (C, t_l)
    mean = jnp.mean(x, axis=0, keepdims=True)              # (1, t_l)
    xc = x - mean
    var = jnp.mean(xc * xc, axis=0, keepdims=True)         # unbiased=False
    inv = lax.rsqrt(var + eps)                             # EUP rsqrt
    o_ref[0] = (xc * inv * g_ref[...]).astype(o_ref.dtype)


def _pick_lane_tile(N, C, L, itemsize):
    """Byte-budgeted lane tile: multiple of 128, sized from C/dtype/VMEM capacity."""
    try:
        vmem_bytes = pltpu.get_tpu_info().vmem_capacity_bytes
    except Exception:  # conservative fallback (v7x-sized)
        vmem_bytes = 64 * 1024 * 1024
    budget = min(vmem_bytes // 4, _BLOCK_BUDGET_CAP)
    # Per lane-column cost:
    #   double-buffered in + out blocks : 2 * 2 * C * itemsize
    #   f32 intermediates (x_f32, xc)   : ~2 * C * 4
    bytes_per_lane = 4 * C * itemsize + 8 * C
    t_l = max(128, min(4096, (budget // bytes_per_lane) // 128 * 128))
    # No point exceeding the (128-padded) spatial extent.
    t_l = min(t_l, pl.cdiv(L, 128) * 128)
    # v7x megacore occupancy: keep enough parallel grid steps for 2 TCs.
    while t_l > 128 and N * pl.cdiv(L, t_l) < 8:
        t_l = max(128, (t_l // 2) // 128 * 128)
    return t_l


def layer_norm(x_nchw, g):
    """Channel-wise LayerNorm of an NCHW tensor (matches the PyTorch module)."""
    N, C, H, W = x_nchw.shape
    L = H * W
    eps = 1e-5 if x_nchw.dtype == jnp.float32 else 1e-3
    t_l = _pick_lane_tile(N, C, L, jnp.dtype(x_nchw.dtype).itemsize)
    grid = (N, pl.cdiv(L, t_l))              # ragged last tile handled by masking

    x3 = x_nchw.reshape(N, C, L)             # free view, no transpose
    g_col = g.reshape(C, 1).astype(jnp.float32)   # gamma stays f32 (no rounding)

    out = pl.pallas_call(
        functools.partial(_layernorm_kernel, eps=eps),
        out_shape=jax.ShapeDtypeStruct((N, C, L), x_nchw.dtype),
        grid_spec=pltpu.PrefetchScalarGridSpec(
            num_scalar_prefetch=0,
            grid=grid,
            in_specs=[pl.BlockSpec((1, C, t_l), lambda n, j: (n, 0, j)),
                      pl.BlockSpec((C, 1), lambda n, j: (0, 0))],
            out_specs=pl.BlockSpec((1, C, t_l), lambda n, j: (n, 0, j))),
        compiler_params=pltpu.CompilerParams(
            dimension_semantics=("parallel", "parallel"),
            vmem_limit_bytes=_VMEM_LIMIT_BYTES),
    )(x3, g_col)
    return out.reshape(N, C, H, W)


# --------------------------- pure-JAX reference ------------------------------

def reference_forward(x_nchw, g):
    eps = 1e-5 if x_nchw.dtype == jnp.float32 else 1e-3
    xf = x_nchw.astype(jnp.float32)
    gf = g.astype(jnp.float32).reshape(1, -1, 1, 1)
    mean = jnp.mean(xf, axis=1, keepdims=True)
    var = jnp.mean((xf - mean) ** 2, axis=1, keepdims=True)
    out = (xf - mean) * lax.rsqrt(var + eps) * gf
    return out.astype(x_nchw.dtype)


def _rel_err(a, b):
    a = a.astype(jnp.float32)
    b = b.astype(jnp.float32)
    return float(jnp.max(jnp.abs(a - b)) / (jnp.max(jnp.abs(b)) + 1e-6))


# ----------------------------------- main ------------------------------------

if __name__ == "__main__":
    key = jax.random.PRNGKey(0)
    kx1, kg1, kx2, kg2, kx3, kg3 = jax.random.split(key, 6)

    # Test 1: float32 (eps = 1e-5), shapes consistent with the module.
    N, C, H, W = 2, 4, 16, 16
    x = jax.random.normal(kx1, (N, C, H, W), jnp.float32)
    g = 1.0 + 0.1 * jax.random.normal(kg1, (1, C, 1, 1), jnp.float32)
    out = jax.block_until_ready(layer_norm(x, g))
    ref = jax.block_until_ready(reference_forward(x, g))
    assert out.shape == x.shape and out.dtype == x.dtype
    assert _rel_err(out, ref) < 1e-5, f"f32 mismatch: rel err {_rel_err(out, ref)}"

    # Test 2: bfloat16 path (eps switches to 1e-3), f32 stats inside the kernel.
    N2, C2, H2, W2 = 2, 8, 16, 16
    x2 = jax.random.normal(kx2, (N2, C2, H2, W2), jnp.float32).astype(jnp.bfloat16)
    g2 = (1.0 + 0.1 * jax.random.normal(kg2, (1, C2, 1, 1), jnp.float32))
    out2 = jax.block_until_ready(layer_norm(x2, g2))
    ref2 = jax.block_until_ready(reference_forward(x2, g2))
    assert out2.dtype == jnp.bfloat16
    assert _rel_err(out2, ref2) < 5e-2, f"bf16 mismatch: rel err {_rel_err(out2, ref2)}"

    # Test 3: spatial extent not a multiple of 128 (ragged last lane tile, cdiv grid).
    N3, C3, H3, W3 = 2, 4, 14, 14
    x3 = jax.random.normal(kx3, (N3, C3, H3, W3), jnp.float32)
    g3 = 1.0 + 0.1 * jax.random.normal(kg3, (1, C3, 1, 1), jnp.float32)
    out3 = jax.block_until_ready(layer_norm(x3, g3))
    ref3 = jax.block_until_ready(reference_forward(x3, g3))
    assert _rel_err(out3, ref3) < 1e-5, f"ragged mismatch: rel err {_rel_err(out3, ref3)}"

    print("KERNEL_OK")
</pallas_src>

<mosaic_0001>
module attributes {stable_mosaic.version = 11 : i64} {
  func.func @_layernorm_kernel(%arg0: i32, %arg1: i32, %arg2: memref<1x4x128xf32, #tpu.memory_space<vmem>>, %arg3: memref<4x1xf32, #tpu.memory_space<vmem>>, %arg4: memref<1x4x128xf32, #tpu.memory_space<vmem>>) attributes {dimension_semantics = [#tpu.dimension_semantics<parallel>, #tpu.dimension_semantics<parallel>], iteration_bounds = array<i64: 2, 2>, scalar_prefetch = 0 : i64, scratch_operands = 0 : i64, tpu.core_type = #tpu.core_type<tc>, window_params = [{transform_indices = @transform_0, window_bounds = array<i64: 1, 4, 128>}, {pipeline_mode = #tpu.pipeline_mode<synchronous>, transform_indices = @transform_1, window_bounds = array<i64: 4, 1>}, {transform_indices = @transform_2, window_bounds = array<i64: 1, 4, 128>}]} {
    %c0 = arith.constant 0 : index
    %c0_0 = arith.constant 0 : index
    %c0_1 = arith.constant 0 : index
    %0 = vector.load %arg2[%c0, %c0_0, %c0_1] : memref<1x4x128xf32, #tpu.memory_space<vmem>>, vector<1x4x128xf32>
    %1 = vector.shape_cast %0 : vector<1x4x128xf32> to vector<4x128xf32>
    %cst = arith.constant dense<0.000000e+00> : vector<128xf32>
    %2 = vector.multi_reduction <add>, %1, %cst [0] : vector<4x128xf32> to vector<128xf32>
    %3 = vector.shape_cast %2 : vector<128xf32> to vector<1x128xf32>
    %cst_2 = arith.constant 4.000000e+00 : f32
    %4 = vector.broadcast %cst_2 : f32 to vector<1x128xf32>
    %5 = arith.divf %3, %4 : vector<1x128xf32>
    %6 = vector.broadcast %5 : vector<1x128xf32> to vector<4x128xf32>
    %7 = arith.subf %1, %6 : vector<4x128xf32>
    %8 = arith.mulf %7, %7 : vector<4x128xf32>
    %cst_3 = arith.constant dense<0.000000e+00> : vector<128xf32>
    %9 = vector.multi_reduction <add>, %8, %cst_3 [0] : vector<4x128xf32> to vector<128xf32>
    %10 = vector.shape_cast %9 : vector<128xf32> to vector<1x128xf32>
    %cst_4 = arith.constant 4.000000e+00 : f32
    %11 = vector.broadcast %cst_4 : f32 to vector<1x128xf32>
    %12 = arith.divf %10, %11 : vector<1x128xf32>
    %cst_5 = arith.constant 9.99999974E-6 : f32
    %13 = vector.broadcast %cst_5 : f32 to vector<1x128xf32>
    %14 = arith.addf %12, %13 : vector<1x128xf32>
    %15 = math.rsqrt %14 : vector<1x128xf32>
    %16 = vector.broadcast %15 : vector<1x128xf32> to vector<4x128xf32>
    %17 = arith.mulf %7, %16 : vector<4x128xf32>
    %c0_6 = arith.constant 0 : index
    %c0_7 = arith.constant 0 : index
    %18 = vector.load %arg3[%c0_6, %c0_7] : memref<4x1xf32, #tpu.memory_space<vmem>>, vector<4x1xf32>
    %19 = vector.broadcast %18 : vector<4x1xf32> to vector<4x128xf32>
    %20 = arith.mulf %17, %19 : vector<4x128xf32>
    %c0_8 = arith.constant 0 : index
    %c0_9 = arith.constant 0 : index
    %c0_10 = arith.constant 0 : index
    %21 = vector.load %arg4[%c0_8, %c0_9, %c0_10] : memref<1x4x128xf32, #tpu.memory_space<vmem>>, vector<1x4x128xf32>
    %22 = vector.shape_cast %21 : vector<1x4x128xf32> to vector<4x128xf32>
    %23 = vector.shape_cast %20 : vector<4x128xf32> to vector<1x4x128xf32>
    tpu.vector_store %arg4[%c0_8, %c0_9, %c0_10], %23 {strides = array<i32>} : memref<1x4x128xf32, #tpu.memory_space<vmem>>, vector<1x4x128xf32>,
    return
  }
  func.func @transform_0(%arg0: i32, %arg1: i32) -> (i32, i32, i32) {
    %c0_i32 = arith.constant 0 : i32
    %c0_i32_0 = arith.constant 0 : i32
    return %arg0, %c0_i32, %arg1 : i32, i32, i32
  }
  func.func @transform_1(%arg0: i32, %arg1: i32) -> (i32, i32) {
    %c0_i32 = arith.constant 0 : i32
    %c0_i32_0 = arith.constant 0 : i32
    %c0_i32_1 = arith.constant 0 : i32
    return %c0_i32, %c0_i32_0 : i32, i32
  }
  func.func @transform_2(%arg0: i32, %arg1: i32) -> (i32, i32, i32) {
    %c0_i32 = arith.constant 0 : i32
    %c0_i32_0 = arith.constant 0 : i32
    return %arg0, %c0_i32, %arg1 : i32, i32, i32
  }
}

</mosaic_0001>

<bundles_post_ra>
// kernel: tpu_custom_call.1
= control target key start
LH: loop header
LB: loop body
LE: loop exit
PB: predicated region body
PF: predicated region fallthrough
CT: control target
= control target key end

     0   :  { %7 = vsyncpa [#allocation3], 0  ;;  %s727_s0 = inlined_call_operand.hbm [shape: f32[2,4,256], index: 0, kind: input, shape index: {}]   ;;  %s728_s1 = inlined_call_operand.vmem [shape: f32[4,1], index: 1, kind: input, shape index: {}]   ;;  %s729_s2 = inlined_call_operand.hbm [shape: f32[2,4,256], index: 2, kind: output, shape index: {}]  }
   0x1   :  { %9 = vsyncpa [#allocation3 + $0x1], 0 }
   0x2   :  { %10 = vsyncpa [#allocation4], 0 }
   0x3   :  { %12 = vsyncpa [#allocation4 + $0x1], 0  ;;  %s576_s9 = smov 0   ;;  %s578_s10 = smov 0  }
   0x4   :  { %s580_s11 = smov 0   ;;  %s582_s12 = smov 0  }
   0x5   :  { %s584_s13 = smov 0   ;;  %s586_s14 = smov 0  }
   0x6   :  { %s588_s15 = smov 0   ;;  %s590_s16 = smov 0  }
   0x7 LB: > { %s329_s17 = sadd.s32 4294967295, %s557_s16   ;;  %s330_s18 = sadd.s32 4294967294, %s557_s16   ;;  %s557_s16 = sphi %s590_s16, %s18_s16   ;;  %s553_s15 = sphi %s588_s15, %s740_s15   ;;  %s549_s14 = sphi %s586_s14, %s739_s14   ;;  %s545_s13 = sphi %s584_s13, %s738_s13   ;;  %s541_s12 = sphi %s582_s12, %s737_s12   ;;  %s537_s11 = sphi %s580_s11, %s736_s11   ;;  %s533_s10 = sphi %s578_s10, %s735_s10   ;;  %s529_s9 = sphi %s576_s9, %s734_s9  }
   0x8   : > { %s27_s19 = sadd.s32 1, %s549_s14  ;;  %s30_s20 = sadd.s32 1, %s553_s15 }
   0x9   : > { %p28_p0 = scmp.ge.s32.totalorder %s27_s19, 2  ;;  %s39_s21 = sadd.s32 1, %s537_s11 }
   0xa   : > { %p46_p1 = scmp.ne.s32.totalorder %s537_s11, %s533_s10  ;;  %p47_p2 = scmp.eq.s32.totalorder %s557_s16, 0 }
   0xb   : > { %s742_s19 = smov (%p28_p0, %s27_s19), 0  ;;  %s744_s20 = smov (!%p28_p0, %s30_s20), %s553_s15 }
   0xc   : > { %s35_s22 = ssub.s32 %s549_s14, %s742_s19  ;;  %p629_p3 = por %p47_p2, %p46_p1 }
   0xd   : > { %p32_p4 = scmp.ge.s32.totalorder %s744_s20, 2  ;;  %p52_p5 = scmp.ne.s32.totalorder %s533_s10, %s529_s9 }
   0xe   : > { %p53_p6 = scmp.eq.s32.totalorder %s329_s17, 0  ;;  %p99_p7 = scmp.eq.s32.totalorder %s329_s17, 3 }
   0xf   : > { %s746_s20 = smov (%p32_p4, %s744_s20), 0  ;;  %p105_p10 = scmp.eq.s32.totalorder %s330_s18, 3 }
  0x10   : > { %p637_p8 = por %p53_p6, %p52_p5  ;;  %p641_p9 = por %p99_p7, %p46_p1 }
  0x11   : > { %s34_s26 = ssub.s32 %s553_s15, %s746_s20  ;;  %p647_p12 = por %p105_p10, %p52_p5 }
  0x12   : > { %s36_s27 = sor.u32 %s35_s22, %s34_s26  ;;  %p356_p13 = scmp.lt.s32.totalorder %s557_s16, 4 }
  0x13   : > { %p37_p11 = scmp.eq.s32.totalorder %s36_s27, 0  ;;  %s128_s29 = sand.u32 1, %s537_s11  }
  0x14   : > { %s333_s3 = sshll.u32 %s128_s29, 2  ;;  %s334_s4 = sshll.u32 %s553_s15, 1 }
  0x15   : > { %s654_s30 = scalar_select %p37_p11, %s537_s11, %s39_s21  }
  0x16   : > { %s136_s5 = sadd.s32 %s549_s14, %s334_s4  ;;  %s132_s6 = scalar_lea.vmem [#allocation2], %s333_s3 }
  0x17   : > { %s142_s7 = sshll.u32 %s132_s6, 4  ;;  %s335_s8 = sshll.u32 %s136_s5, 2  ;;  %s143_s7 = int_to_ptr.vmem [resolvable:$true] %s142_s7 }
  0x18   : > { %s138_s22 = scalar_lea.hbm %s727_s0, %s335_s8  ;;  %p349_p0 = pnand %p356_p13, %p629_p3 }
  0x19   : > { %s140_s26 = sshll.u32 %s138_s22, 4  ;;  %p336_p1 = scmp.ge.s32.totalorder %s557_s16, 1  ;;  %s141_s26 = int_to_ptr.hbm [resolvable:$true] %s140_s26 }
  0x1a   : > { %s129_s27 = scalar_lea.sflag [#allocation3], %s128_s29  ;;  %p147_p2 = scmp.lt.s32.totalorder %s557_s16, 5 }
  0x1b   : > { %351 = dma.hbm_to_vmem [thread:$0]  (!%p349_p0), %s141_s26, 64, %s143_s7, %s129_s27  }
  0x1c   : > { %p148_p4 = pnand %p336_p1, %p147_p2 }
  0x1d   : > { %s666_s21 = sand.u32 (!%p148_p4), 1, %s533_s10  }
  0x1e   : > { %151 = sbr.rel (%p148_p4) target bundleno = 158 (0x9e), region = 28  ;;  %s337_s3 = sshll.u32 (!%p148_p4), %s666_s21, 2 }
  0x1f   : > { %s154_s4 = scalar_lea.sflag (!%p148_p4), [#allocation3], %s666_s21  ;;  %s157_s23 = scalar_lea.vmem (!%p148_p4), [#allocation2], %s337_s3 }
  0x23   : > { %520 = dma.done.wait (%p637_p8), %s154_s4, 64  }
  0x24   : > { %522 = vsyncadd (%p637_p8), %s154_s4, 4294967232  ;;  %v559_v0 = vmov 0   ;;  %v218_v1 = vld [vmem:[%s728_s1] sm:$0xf]  ;;  %v560_v2 = vmov 4.0   ;;  %vm180_vm0 = vcmask 1043456  }
  0x25   : > { %424 = vset.pattern.permute.xlu0 %v559_v0  ;;  %425 = vrcp.f32 %v560_v2  ;;  %v179_v6 = vld [vmem:[%s157_s23] sm:$0xf]  ;;  %s340_s24 = sshll.u32 %s545_s13, 1  ;;  %s178_s22 = scalar_lea.vmem [#allocation5], %s337_s3 }
  0x26   : > { %221 = vperm.xlu0 %424, %v218_v1   ;;  %v181_v7 = vsel %vm180_vm0, %v179_v6, 0.0  ;;  %s237_s6 = sadd.s32 %s541_s12, %s340_s24  ;;  %s241_s26 = sshll.u32 %s178_s22, 4  ;;  %s242_s26 = int_to_ptr.vmem [resolvable:$true] %s241_s26 }
  0x27   : > { %v182_v8 = vrot.slane %v181_v7, 4  ;;  %s341_s7 = sshll.u32 %s237_s6, 2  ;;  %s227_s12 = scalar_lea.sflag [#allocation4], %s666_s21 }
  0x28   : > { %s239_s18 = scalar_lea.hbm %s729_s2, %s341_s7  ;;  %s479_s5 = scalar_lea.hbm %s729_s2, 16 }
  0x29   : > { %v183_v10 = vadd.f32 %v182_v8, %v181_v7  ;;  %s243_s27 = sshll.u32 %s239_s18, 4  ;;  %s244_s27 = int_to_ptr.hbm [resolvable:$true] %s243_s27 }
  0x2a   : > { %s473_s13 = sshra.s32 %s244_s27, 4  ;;  %s474_s13 = int_to_ptr.hbm [resolvable:$true] %s473_s13 }
  0x2b   : > { %v426_v3 = vpop.eup %425  ;;  %v184_v11 = vrot.slane %v183_v10, 2  ;;  %s475_s4 = scalar_lea.hbm %s474_s13, 4  ;;  %p480_p7 = scmp.lt.s32.totalorder %s474_s13, %s729_s2 }
  0x2c   : > { %v189_v4 = vmul.f32 4.0, %v426_v3  ;;  %vm193_vm1 = vweird.f32 %v426_v3  ;;  %p476_p3 = scmp.ne.s32.totalorder %s474_s13, %s475_s4  ;;  %p481_p8 = scmp.lt.s32.totalorder %s479_s5, %s475_s4 }
  0x2d   : > { %v185_v13 = vadd.f32 %v184_v11, %v183_v10 }
  0x2e   : > { %v190_v5 = vsub.f32 1.0, %v189_v4  ;;  %p477_p5 = pnand %p476_p3, %p641_p9  ;;  %p482_p10 = por %p481_p8, %p480_p7 }
  0x2f   : > { %v186_v14 = vrot.slane %v185_v13, 1 }
  0x30   : > { %v191_v9 = vmul.f32 %v426_v3, %v190_v5  ;;  %p478_p6 = pneg %p477_p5 }
  0x31   : > { %v187_v16 = vadd.f32 %v186_v14, %v185_v13 }
  0x32   : > { %v192_v12 = vadd.f32 %v426_v3, %v191_v9  ;;  %p483_p11 = pnand %p482_p10, %p478_p6 }
  0x34   : > { %v194_v15 = vsel %vm193_vm1, %v426_v3, %v192_v12 }
  0x35   : > { %v195_v17 = vmul.f32 %v194_v15, %v187_v16 }
  0x37   : > { %v196_v18 = vsub.f32 %v179_v6, %v195_v17 }
  0x39   : > { %v197_v19 = vmul.f32 %v196_v18, %v196_v18 }
  0x3b   : > { %v198_v20 = vsel %vm180_vm0, %v197_v19, 0.0 }
  0x3c   : > { %v199_v21 = vrot.slane %v198_v20, 4 }
  0x3e   : > { %v200_v22 = vadd.f32 %v199_v21, %v198_v20 }
  0x40   : > { %v201_v23 = vrot.slane %v200_v22, 2 }
  0x42   : > { %v202_v24 = vadd.f32 %v201_v23, %v200_v22 }
  0x44   : > { %v203_v25 = vrot.slane %v202_v24, 1 }
  0x46   : > { %v204_v26 = vadd.f32 %v203_v25, %v202_v24 }
  0x48   : > { %v205_v27 = vmul.f32 %v204_v26, %v194_v15 }
  0x4a   : > { %v206_v28 = vadd.f32 1e-05, %v205_v27 }
  0x4c   : > { %427 = vrsqrt.f32 %v206_v28  ;;  %vm213_vm2 = vweird.f32 %v206_v28 }
  0x52   : > { %v428_v29 = vpop.eup %427 }
  0x53   : > { %v208_v30 = vmul.f32 %v428_v29, %v206_v28  ;;  %vm214_vm3 = vweird.f32 %v428_v29 }
  0x54   : > { %vm215_vm4 = vmor %vm213_vm2, %vm214_vm3 }
  0x55   : > { %v209_v31 = vmul.f32 %v428_v29, %v208_v30 }
  0x57   : > { %v210_v32 = vmul.f32 0.5, %v209_v31 }
  0x59   : > { %v211_v33 = vsub.f32 1.5, %v210_v32 }
  0x5b   : > { %v212_v34 = vmul.f32 %v428_v29, %v211_v33 }
  0x5d   : > { %v216_v35 = vsel %vm215_vm4, %v428_v29, %v212_v34 }
  0x5e   : > { %v217_v36 = vmul.f32 %v216_v35, %v196_v18 }
  0x98   : > { %v222_v37 = vpop.permute.xlu0 %221 }
  0x99   : > { %v224_v38 = vmul.f32 %v222_v37, %v217_v36 }
  0x9b   : > { %225 = vst [vmem:[%s178_s22] sm:$0xf] %v224_v38 }
  0x9c   : > { %486 = shalt.err (!%p483_p11)
}
  0x9d   : > { %346 = dma.vmem_to_hbm [thread:$0]  (%p641_p9), %s242_s26, 64, %s244_s27, %s227_s12  }
  0x9e PF: > { %p357_p13 = scmp.ge.s32.totalorder %s557_s16, 2  ;;  %s255_s21 = sand.u32 1, %s529_s9  }
  0x9f   : > { %s256_s6 = scalar_lea.sflag [#allocation4], %s255_s21 }
  0xa0   : > { %p353_p0 = pnand %p357_p13, %p647_p12 }
  0xa2   : > { %p354_p1 = pneg %p353_p0 }
  0xa4   : > { %524 = dma.done.wait (%p354_p1), %s256_s6, 64  }
  0xa5   : > { %526 = vsyncadd (%p354_p1), %s256_s6, 4294967232  ;;  %s18_s16 = sadd.s32 1, %s557_s16   ;;  %s734_s9 = smov %s533_s10 }
  0xa6   : > { %p15_p2 = scmp.ge.s32.totalorder %s18_s16, 6   ;;  %s735_s10 = smov %s537_s11 }
  0xa7   : > { %s736_s11 = smov %s654_s30  ;;  %s737_s12 = smov %s549_s14 }
  0xa8   : > { %s738_s13 = smov %s553_s15  ;;  %s739_s14 = smov %s742_s19 }
  0xa9   : > { %s740_s15 = smov %s746_s20  ;;  %17 = sbr.rel (!%p15_p2) target bundleno = 7 (0x7), region = 73 }
  0xae   :  { %262 = vsyncpa [#allocation3], 1 }
  0xaf   :  { %264 = vsyncpa [#allocation3 + $0x1], 1 }
  0xb0   :  { %265 = vsyncpa [#allocation4], 1 }
  0xb1   :  { %267 = vsyncpa [#allocation4 + $0x1], 1 }

</bundles_post_ra>
